<compile_context>
chip_gen: v5e
topology: v5e:2x2
jax: 0.10.0
libtpu: 0.0.40
codegen_flags: <defaults>
</compile_context>

<pallas_src>
import functools

import jax
import jax.numpy as jnp
from jax.experimental import pallas as pl
from jax.experimental.pallas import tpu as pltpu


_TARGET_BLOCK_BYTES = 2 * 1024 * 1024   # ~2 MiB x-blocks: >85% of the HBM roofline
_VMEM_BUDGET_BYTES = 24 * 1024 * 1024   # headroom under the 32 MiB scoped default (v7x-safe)
_MAX_BATCH_BLOCK = 8                    # cap static unroll in the fused kernel


# ----------------------------------------------------------------------------
# Fused single-pass kernel (spatial extent fits one lane-dense block).
# ----------------------------------------------------------------------------
def _fused_kernel(x_ref, w1_ref, w2_ref, o_ref, *, nb):
    # x_ref/o_ref: (NB, C, HW);  w1_ref: (C_r, C) pre-scaled by 1/HW;  w2_ref: (C, C_r)
    for n in range(nb):                                        # static unroll, nb <= 8
        x = x_ref[n].astype(jnp.float32)                       # (C, HW)
        pooled = jnp.sum(x, axis=-1, keepdims=True)            # (C, 1) raw spatial sum
        h = jnp.maximum(
            jnp.dot(w1_ref[...], pooled, preferred_element_type=jnp.float32), 0.0)
        s = jax.nn.sigmoid(
            jnp.dot(w2_ref[...], h, preferred_element_type=jnp.float32))   # (C, 1)
        o_ref[n] = (x * s).astype(o_ref.dtype)


# ----------------------------------------------------------------------------
# Two-pass path: pass 1 = tiled pool + MLP -> scale, pass 2 = tiled rescale.
# ----------------------------------------------------------------------------
def _pool_mlp_kernel(x_ref, w1_ref, w2_ref, s_ref, acc_ref, *, hw, hw_tile):
    # x_ref: (1, C, HW_TILE); s_ref: (1, C, 1) f32; acc_ref: (C, 1) f32 scratch.
    t = pl.program_id(1)

    @pl.when(t == 0)
    def _init():
        acc_ref[...] = jnp.zeros_like(acc_ref)

    x = x_ref[0].astype(jnp.float32)                           # (C, HW_TILE)
    if hw % hw_tile != 0:
        # Ragged last spatial tile: zero the out-of-range lanes before reducing.
        col = jax.lax.broadcasted_iota(jnp.int32, x.shape, 1) + t * hw_tile
        x = jnp.where(col < hw, x, 0.0)
    acc_ref[...] += jnp.sum(x, axis=-1, keepdims=True)         # partial spatial sums (f32)

    @pl.when(t == pl.num_programs(1) - 1)
    def _finalize():
        pooled = acc_ref[...]                                  # (C, 1) raw sum; w1 has 1/HW
        h = jnp.maximum(
            jnp.dot(w1_ref[...], pooled, preferred_element_type=jnp.float32), 0.0)
        s_ref[0] = jax.nn.sigmoid(
            jnp.dot(w2_ref[...], h, preferred_element_type=jnp.float32))   # (C, 1)


def _scale_kernel(x_ref, s_ref, o_ref):
    # x_ref/o_ref: (1, C, HW_TILE); s_ref: (1, C, 1) f32.
    x = x_ref[0].astype(jnp.float32)
    o_ref[0] = (x * s_ref[0]).astype(o_ref.dtype)


# ----------------------------------------------------------------------------
# Wrapper
# ----------------------------------------------------------------------------
def channel_attention(x, w1, w2, *, hw_tile=None):
    """x: (N, C, H, W);  w1: (C//r, C) [conv1 1x1];  w2: (C, C//r) [conv2 1x1]."""
    N, C, H, W = x.shape
    C_r = w1.shape[0]
    assert w1.shape == (C_r, C) and w2.shape == (C, C_r)
    HW = H * W
    itemsize = x.dtype.itemsize

    x_flat = x.reshape(N, C, HW)
    # Fold the average-pool 1/HW into the first 1x1-conv weight (positive scale
    # commutes with ReLU), so the kernels only need raw spatial sums.
    w1s = w1.astype(jnp.float32) * (1.0 / HW)
    w2f = w2.astype(jnp.float32)

    row_bytes = C * HW * itemsize

    if hw_tile is None:
        if row_bytes <= _TARGET_BLOCK_BYTES:
            hw_tile = HW                                       # fused path
        else:
            t = _TARGET_BLOCK_BYTES // (C * itemsize)
            # Pass 2 double-buffers in+out: 4 * C * hw_tile * itemsize must fit budget.
            t = min(t, _VMEM_BUDGET_BYTES // (4 * C * itemsize))
            hw_tile = max(128, (t // 128) * 128)               # lane-dense tiles
    hw_tile = min(hw_tile, HW)

    if hw_tile >= HW:
        # ---- Fused single pass: pool + MLP + scale; x read exactly once. ----
        # Fold batch elements into one block to amortize per-grid-step overhead.
        nb = 1
        for d in range(1, min(N, _MAX_BATCH_BLOCK) + 1):
            if N % d == 0 and d * row_bytes <= max(_TARGET_BLOCK_BYTES, row_bytes):
                nb = d
        out = pl.pallas_call(
            functools.partial(_fused_kernel, nb=nb),
            out_shape=jax.ShapeDtypeStruct((N, C, HW), x.dtype),
            grid_spec=pltpu.PrefetchScalarGridSpec(
                num_scalar_prefetch=0,
                grid=(N // nb,),
                in_specs=[
                    pl.BlockSpec((nb, C, HW), lambda i: (i, 0, 0)),
                    pl.BlockSpec((C_r, C), lambda i: (0, 0)),
                    pl.BlockSpec((C, C_r), lambda i: (0, 0)),
                ],
                out_specs=pl.BlockSpec((nb, C, HW), lambda i: (i, 0, 0)),
            ),
            compiler_params=pltpu.CompilerParams(
                dimension_semantics=("parallel",)),
        )(x_flat, w1s, w2f)
        return out.reshape(N, C, H, W)

    # ---- Two-pass path for large spatial extents (VMEM-budgeted tiles). ----
    num_t = pl.cdiv(HW, hw_tile)

    # Pass 1: tiled spatial sum (reduction axis last) + per-image MLP -> scale.
    scale = pl.pallas_call(
        functools.partial(_pool_mlp_kernel, hw=HW, hw_tile=hw_tile),
        out_shape=jax.ShapeDtypeStruct((N, C, 1), jnp.float32),
        grid_spec=pltpu.PrefetchScalarGridSpec(
            num_scalar_prefetch=0,
            grid=(N, num_t),
            in_specs=[
                pl.BlockSpec((1, C, hw_tile), lambda n, t: (n, 0, t)),
                pl.BlockSpec((C_r, C), lambda n, t: (0, 0)),
                pl.BlockSpec((C, C_r), lambda n, t: (0, 0)),
            ],
            out_specs=pl.BlockSpec((1, C, 1), lambda n, t: (n, 0, 0)),
            scratch_shapes=[pltpu.VMEM((C, 1), jnp.float32)],
        ),
        compiler_params=pltpu.CompilerParams(
            dimension_semantics=("parallel", "arbitrary")),
    )(x_flat, w1s, w2f)

    # Pass 2: tile-by-tile rescale; both grid axes parallel (v7x 2-TC sharding).
    out = pl.pallas_call(
        _scale_kernel,
        out_shape=jax.ShapeDtypeStruct((N, C, HW), x.dtype),
        grid_spec=pltpu.PrefetchScalarGridSpec(
            num_scalar_prefetch=0,
            grid=(N, num_t),
            in_specs=[
                pl.BlockSpec((1, C, hw_tile), lambda n, t: (n, 0, t)),
                pl.BlockSpec((1, C, 1), lambda n, t: (n, 0, 0)),
            ],
            out_specs=pl.BlockSpec((1, C, hw_tile), lambda n, t: (n, 0, t)),
        ),
        compiler_params=pltpu.CompilerParams(
            dimension_semantics=("parallel", "parallel")),
    )(x_flat, scale)

    return out.reshape(N, C, H, W)


def channel_attention_ref(x, w1, w2):
    pooled = jnp.mean(x, axis=(2, 3))                          # (N, C)
    h = jnp.maximum(pooled @ w1.T, 0.0)                        # (N, C//r)
    s = jax.nn.sigmoid(h @ w2.T)                               # (N, C)
    return x * s[:, :, None, None]


if __name__ == "__main__":
    key = jax.random.PRNGKey(0)
    kx, k1, k2, kx2 = jax.random.split(key, 4)

    N, C = 2, 64
    reduction = 16
    C_r = C // reduction
    w1 = jax.random.normal(k1, (C_r, C), dtype=jnp.float32) * 0.1   # conv1 (C//r, C, 1, 1)
    w2 = jax.random.normal(k2, (C, C_r), dtype=jnp.float32) * 0.1   # conv2 (C, C//r, 1, 1)

    # Case A: small spatial -> fused single-pass path (batch folded into one block).
    H, W = 16, 16
    x = jax.random.normal(kx, (N, C, H, W), dtype=jnp.float32)
    out = jax.block_until_ready(channel_attention(x, w1, w2))
    ref = channel_attention_ref(x, w1, w2)
    assert out.shape == (N, C, H, W)
    assert jnp.allclose(out, ref, atol=1e-4, rtol=1e-4), "fused path mismatch"

    # Case B: larger spatial, forced tiling -> two-pass path with a ragged last tile.
    H2 = W2 = 48                                              # HW = 2304, 2304 % 512 != 0
    x2 = jax.random.normal(kx2, (N, C, H2, W2), dtype=jnp.float32)
    ref2 = channel_attention_ref(x2, w1, w2)
    out2 = jax.block_until_ready(channel_attention(x2, w1, w2, hw_tile=512))
    assert jnp.allclose(out2, ref2, atol=1e-4, rtol=1e-4), "two-pass (ragged) mismatch"

    # Case C: two-pass path with an evenly dividing, lane-dense spatial tile.
    out3 = jax.block_until_ready(channel_attention(x2, w1, w2, hw_tile=1152))
    assert jnp.allclose(out3, ref2, atol=1e-4, rtol=1e-4), "two-pass (even) mismatch"

    print("KERNEL_OK")
</pallas_src>

<mosaic_0001>
module attributes {stable_mosaic.version = 11 : i64} {
  func.func @_fused_kernel(%arg0: i32, %arg1: memref<2x64x256xf32, #tpu.memory_space<vmem>>, %arg2: memref<4x64xf32, #tpu.memory_space<vmem>>, %arg3: memref<64x4xf32, #tpu.memory_space<vmem>>, %arg4: memref<2x64x256xf32, #tpu.memory_space<vmem>>) attributes {dimension_semantics = [#tpu.dimension_semantics<parallel>], iteration_bounds = array<i64: 1>, scalar_prefetch = 0 : i64, scratch_operands = 0 : i64, tpu.core_type = #tpu.core_type<tc>, window_params = [{transform_indices = @transform_0, window_bounds = array<i64: 2, 64, 256>}, {pipeline_mode = #tpu.pipeline_mode<synchronous>, transform_indices = @transform_1, window_bounds = array<i64: 4, 64>}, {pipeline_mode = #tpu.pipeline_mode<synchronous>, transform_indices = @transform_2, window_bounds = array<i64: 64, 4>}, {transform_indices = @transform_3, window_bounds = array<i64: 2, 64, 256>}]} {
    %c0 = arith.constant 0 : index
    %c0_0 = arith.constant 0 : index
    %c0_1 = arith.constant 0 : index
    %0 = vector.load %arg1[%c0, %c0_0, %c0_1] : memref<2x64x256xf32, #tpu.memory_space<vmem>>, vector<1x64x256xf32>
    %1 = vector.shape_cast %0 : vector<1x64x256xf32> to vector<64x256xf32>
    %cst = arith.constant dense<0.000000e+00> : vector<64xf32>
    %2 = vector.multi_reduction <add>, %1, %cst [1] : vector<64x256xf32> to vector<64xf32>
    %3 = vector.shape_cast %2 : vector<64xf32> to vector<64x1xf32>
    %c0_2 = arith.constant 0 : index
    %c0_3 = arith.constant 0 : index
    %4 = vector.load %arg2[%c0_2, %c0_3] : memref<4x64xf32, #tpu.memory_space<vmem>>, vector<4x64xf32>
    %cst_4 = arith.constant dense<0.000000e+00> : vector<4x1xf32>
    %5 = tpu.matmul %4, %3, %cst_4 {dimension_numbers = #tpu.dot_dimension_numbers<[1], [0], [0], [1], [0, 0, 1, 1], [], []>} : vector<4x64xf32>, vector<64x1xf32>, vector<4x1xf32> -> vector<4x1xf32>
    %cst_5 = arith.constant 0.000000e+00 : f32
    %6 = vector.broadcast %cst_5 : f32 to vector<4x1xf32>
    %7 = arith.maximumf %5, %6 : vector<4x1xf32>
    %c0_6 = arith.constant 0 : index
    %c0_7 = arith.constant 0 : index
    %8 = vector.load %arg3[%c0_6, %c0_7] : memref<64x4xf32, #tpu.memory_space<vmem>>, vector<64x4xf32>
    %cst_8 = arith.constant dense<0.000000e+00> : vector<64x1xf32>
    %9 = tpu.matmul %8, %7, %cst_8 {dimension_numbers = #tpu.dot_dimension_numbers<[1], [0], [0], [1], [0, 0, 1, 1], [], []>} : vector<64x4xf32>, vector<4x1xf32>, vector<64x1xf32> -> vector<64x1xf32>
    %10 = arith.negf %9 : vector<64x1xf32>
    %11 = math.exp %10 : vector<64x1xf32>
    %cst_9 = arith.constant 1.000000e+00 : f32
    %12 = vector.broadcast %cst_9 : f32 to vector<64x1xf32>
    %13 = arith.addf %12, %11 : vector<64x1xf32>
    %14 = arith.divf %12, %13 : vector<64x1xf32>
    %15 = vector.broadcast %14 : vector<64x1xf32> to vector<64x256xf32>
    %16 = arith.mulf %1, %15 : vector<64x256xf32>
    %c0_10 = arith.constant 0 : index
    %c0_11 = arith.constant 0 : index
    %c0_12 = arith.constant 0 : index
    %17 = vector.load %arg4[%c0_10, %c0_11, %c0_12] : memref<2x64x256xf32, #tpu.memory_space<vmem>>, vector<1x64x256xf32>
    %18 = vector.shape_cast %17 : vector<1x64x256xf32> to vector<64x256xf32>
    %19 = vector.shape_cast %16 : vector<64x256xf32> to vector<1x64x256xf32>
    tpu.vector_store %arg4[%c0_10, %c0_11, %c0_12], %19 {strides = array<i32>} : memref<2x64x256xf32, #tpu.memory_space<vmem>>, vector<1x64x256xf32>,
    %c1 = arith.constant 1 : index
    %c0_13 = arith.constant 0 : index
    %c0_14 = arith.constant 0 : index
    %20 = vector.load %arg1[%c1, %c0_13, %c0_14] : memref<2x64x256xf32, #tpu.memory_space<vmem>>, vector<1x64x256xf32>
    %21 = vector.shape_cast %20 : vector<1x64x256xf32> to vector<64x256xf32>
    %cst_15 = arith.constant dense<0.000000e+00> : vector<64xf32>
    %22 = vector.multi_reduction <add>, %21, %cst_15 [1] : vector<64x256xf32> to vector<64xf32>
    %23 = vector.shape_cast %22 : vector<64xf32> to vector<64x1xf32>
    %c0_16 = arith.constant 0 : index
    %c0_17 = arith.constant 0 : index
    %24 = vector.load %arg2[%c0_16, %c0_17] : memref<4x64xf32, #tpu.memory_space<vmem>>, vector<4x64xf32>
    %cst_18 = arith.constant dense<0.000000e+00> : vector<4x1xf32>
    %25 = tpu.matmul %24, %23, %cst_18 {dimension_numbers = #tpu.dot_dimension_numbers<[1], [0], [0], [1], [0, 0, 1, 1], [], []>} : vector<4x64xf32>, vector<64x1xf32>, vector<4x1xf32> -> vector<4x1xf32>
    %cst_19 = arith.constant 0.000000e+00 : f32
    %26 = vector.broadcast %cst_19 : f32 to vector<4x1xf32>
    %27 = arith.maximumf %25, %26 : vector<4x1xf32>
    %c0_20 = arith.constant 0 : index
    %c0_21 = arith.constant 0 : index
    %28 = vector.load %arg3[%c0_20, %c0_21] : memref<64x4xf32, #tpu.memory_space<vmem>>, vector<64x4xf32>
    %cst_22 = arith.constant dense<0.000000e+00> : vector<64x1xf32>
    %29 = tpu.matmul %28, %27, %cst_22 {dimension_numbers = #tpu.dot_dimension_numbers<[1], [0], [0], [1], [0, 0, 1, 1], [], []>} : vector<64x4xf32>, vector<4x1xf32>, vector<64x1xf32> -> vector<64x1xf32>
    %30 = arith.negf %29 : vector<64x1xf32>
    %31 = math.exp %30 : vector<64x1xf32>
    %cst_23 = arith.constant 1.000000e+00 : f32
    %32 = vector.broadcast %cst_23 : f32 to vector<64x1xf32>
    %33 = arith.addf %32, %31 : vector<64x1xf32>
    %34 = arith.divf %32, %33 : vector<64x1xf32>
    %35 = vector.broadcast %34 : vector<64x1xf32> to vector<64x256xf32>
    %36 = arith.mulf %21, %35 : vector<64x256xf32>
    %c1_24 = arith.constant 1 : index
    %c0_25 = arith.constant 0 : index
    %c0_26 = arith.constant 0 : index
    %37 = vector.load %arg4[%c1_24, %c0_25, %c0_26] : memref<2x64x256xf32, #tpu.memory_space<vmem>>, vector<1x64x256xf32>
    %38 = vector.shape_cast %37 : vector<1x64x256xf32> to vector<64x256xf32>
    %39 = vector.shape_cast %36 : vector<64x256xf32> to vector<1x64x256xf32>
    tpu.vector_store %arg4[%c1_24, %c0_25, %c0_26], %39 {strides = array<i32>} : memref<2x64x256xf32, #tpu.memory_space<vmem>>, vector<1x64x256xf32>,
    return
  }
  func.func @transform_0(%arg0: i32) -> (i32, i32, i32) {
    %c0_i32 = arith.constant 0 : i32
    %c0_i32_0 = arith.constant 0 : i32
    %c0_i32_1 = arith.constant 0 : i32
    return %arg0, %c0_i32, %c0_i32_0 : i32, i32, i32
  }
  func.func @transform_1(%arg0: i32) -> (i32, i32) {
    %c0_i32 = arith.constant 0 : i32
    %c0_i32_0 = arith.constant 0 : i32
    %c0_i32_1 = arith.constant 0 : i32
    return %c0_i32, %c0_i32_0 : i32, i32
  }
  func.func @transform_2(%arg0: i32) -> (i32, i32) {
    %c0_i32 = arith.constant 0 : i32
    %c0_i32_0 = arith.constant 0 : i32
    %c0_i32_1 = arith.constant 0 : i32
    return %c0_i32, %c0_i32_0 : i32, i32
  }
  func.func @transform_3(%arg0: i32) -> (i32, i32, i32) {
    %c0_i32 = arith.constant 0 : i32
    %c0_i32_0 = arith.constant 0 : i32
    %c0_i32_1 = arith.constant 0 : i32
    return %arg0, %c0_i32, %c0_i32_0 : i32, i32, i32
  }
}

</mosaic_0001>

<bundles_post_ra>
// kernel: tpu_custom_call.1
= control target key start
LH: loop header
LB: loop body
LE: loop exit
PB: predicated region body
PF: predicated region fallthrough
CT: control target
= control target key end

     0   :  { %8 = vsyncpa [#allocation3], 0  ;;  %s1449_s0 = inlined_call_operand.hbm [shape: f32[2,64,256], index: 0, kind: input, shape index: {}]   ;;  %s1450_s1 = inlined_call_operand.vmem [shape: f32[4,64], index: 1, kind: input, shape index: {}]   ;;  %s1451_s2 = inlined_call_operand.vmem [shape: f32[64,4], index: 2, kind: input, shape index: {}]   ;;  %s1452_s3 = inlined_call_operand.hbm [shape: f32[2,64,256], index: 3, kind: output, shape index: {}]  }
   0x1   :  { %9 = vsyncpa [#allocation4], 0  ;;  %s14_s14 = sshll.u32 %s1449_s0, 4  ;;  %s957_s15 = smov [#allocation2]   ;;  %s15_s14 = int_to_ptr.hbm [resolvable:$true] %s14_s14 }
   0x2   :  { %s16_s16 = sshll.u32 %s957_s15, 4  ;;  %s958_s17 = smov 256   ;;  %s17_s16 = int_to_ptr.vmem [resolvable:$true] %s16_s16 }
   0x3   :  { %s959_s18 = smov 16  }
   0x4   :  { %22 = dma.hbm_to_vmem [thread:$0]  %s15_s14, 4096, %s17_s16, [#allocation3], %s958_s17, %s958_s17, %s959_s18  }
   0x5   :  { %953 = dma.done.wait [#allocation3], 4096  }
   0x6   :  { %954 = vsyncadd [#allocation3], 4294963200  ;;  %v414_v0 = vld [vmem:[#allocation2 + $0xf0] sm:$0xff]  ;;  %v415_v1 = vld [vmem:[#allocation2 + $0xf8] sm:$0xff]  ;;  %vm72_vm0 = vcmask 523264   ;;  %vm130_vm1 = vcmask 1043456  }
   0x7   :  { %v410_v2 = vld [vmem:[#allocation2 + $0xd0] sm:$0xff]  ;;  %v437_v3 = vadd.f32 %v415_v1, %v414_v0  ;;  %v411_v4 = vld [vmem:[#allocation2 + $0xd8] sm:$0xff]  ;;  %v412_v9 = vld [vmem:[#allocation2 + $0xe0] sm:$0xff]  ;;  %vm105_vm2 = vcmask 31744   ;;  %s772_s13 = sshll.u32 %s1452_s3, 4  ;;  %s773_s13 = int_to_ptr.hbm [resolvable:$true] %s772_s13 }
   0x8   :  { %v406_v5 = vld [vmem:[#allocation2 + $0xb0] sm:$0xff]  ;;  %v407_v6 = vld [vmem:[#allocation2 + $0xb8] sm:$0xff]  ;;  %v431_v7 = vadd.f32 %v411_v4, %v410_v2  ;;  %v413_v10 = vld [vmem:[#allocation2 + $0xe8] sm:$0xff] }
   0x9   :  { %v425_v8 = vadd.f32 %v407_v6, %v406_v5  ;;  %438 = vadd.xlane.f32.xlu0 %v437_v3  ;;  %v988_v11 = vld [vmem:[#allocation2 + $0xc0] sm:$0xff]  ;;  %v990_v12 = vld [vmem:[#allocation2 + $0xc8] sm:$0xff]  ;;  %v434_v15 = vadd.f32 %v413_v10, %v412_v9  ;;  %v1000_v18 = vld [vmem:[#allocation2 + $0x70] sm:$0xff] }
   0xa   :  { %432 = vadd.xlane.f32.xlu1 %v431_v7  ;;  %v992_v13 = vld [vmem:[#allocation2 + $0xa0] sm:$0xff]  ;;  %v994_v14 = vld [vmem:[#allocation2 + $0xa8] sm:$0xff]  ;;  %v428_v16 = vadd.f32 %v990_v12, %v988_v11  ;;  %v1002_v19 = vld [vmem:[#allocation2 + $0x78] sm:$0xff] }
   0xb   :  { %426 = vadd.xlane.f32.xlu2 %v425_v8  ;;  %v422_v17 = vadd.f32 %v994_v14, %v992_v13  ;;  %v1004_v20 = vld [vmem:[#allocation2 + $0x90] sm:$0xff]  ;;  %v1006_v21 = vld [vmem:[#allocation2 + $0x98] sm:$0xff]  ;;  %v43_v22 = vld [vmem:[#allocation2 + $0x60] sm:$0xff]  ;;  %v68_v24 = vadd.f32 %v1002_v19, %v1000_v18 }
   0xc   :  { %v44_v23 = vld [vmem:[#allocation2 + $0x68] sm:$0xff]  ;;  %v419_v25 = vadd.f32 %v1006_v21, %v1004_v20  ;;  %v1012_v27 = vld [vmem:[#allocation2 + $0x80] sm:$0xff]  ;;  %v1016_v29 = vld [vmem:[#allocation2 + $0x50] sm:$0xff] }
   0xd   :  { %v65_v26 = vadd.f32 %v44_v23, %v43_v22  ;;  %v1014_v28 = vld [vmem:[#allocation2 + $0x88] sm:$0xff]  ;;  %v1018_v30 = vld [vmem:[#allocation2 + $0x58] sm:$0xff]  ;;  %v1020_v31 = vld [vmem:[#allocation2 + $0x40] sm:$0xff] }
   0xe   :  { %v1022_v32 = vld [vmem:[#allocation2 + $0x48] sm:$0xff]  ;;  %v416_v33 = vadd.f32 %v1014_v28, %v1012_v27  ;;  %v62_v34 = vadd.f32 %v1018_v30, %v1016_v29  ;;  %v1030_v36 = vld [vmem:[#allocation2 + $0x30] sm:$0xff]  ;;  %v1032_v37 = vld [vmem:[#allocation2 + $0x38] sm:$0xff] }
   0xf   :  { %v59_v35 = vadd.f32 %v1022_v32, %v1020_v31  ;;  %v1034_v38 = vld [vmem:[#allocation2 + $0x20] sm:$0xff]  ;;  %v1036_v39 = vld [vmem:[#allocation2 + $0x28] sm:$0xff]  ;;  %v1038_v40 = vld [vmem:[#allocation2 + $0x10] sm:$0xff]  ;;  %v56_v42 = vadd.f32 %v1032_v37, %v1030_v36 }
  0x10   :  { %v1040_v41 = vld [vmem:[#allocation2 + $0x18] sm:$0xff]  ;;  %v53_v43 = vadd.f32 %v1036_v39, %v1034_v38  ;;  %v1048_v45 = vld [vmem:[#allocation2] sm:$0xff]  ;;  %v1050_v46 = vld [vmem:[#allocation2 + $0x8] sm:$0xff] }
  0x11   :  { %435 = vadd.xlane.f32.xlu0 %v434_v15  ;;  %v50_v44 = vadd.f32 %v1040_v41, %v1038_v40  ;;  %v47_v47 = vadd.f32 %v1050_v46, %v1048_v45  ;;  %v440_v57 = vld [vmem:[%s1450_s1] sm:$0xf]  ;;  %v467_v4 = vld [vmem:[%s1451_s2 + $0x10] sm:$0xff]  ;;  %v468_v6 = vld [vmem:[%s1451_s2 + $0x18] sm:$0xff] }
  0x12   :  { %429 = vadd.xlane.f32.xlu1 %v428_v16  ;;  %v71_v0 = vld [vmem:[%s1450_s1] sm:$0xf]  ;;  %v466_v7 = vld [vmem:[%s1451_s2 + $0x8] sm:$0xff]  ;;  %v471_v16 = vld [vmem:[%s1451_s2 + $0x30] sm:$0xff] }
  0x13   :  { %423 = vadd.xlane.f32.xlu2 %v422_v17  ;;  %v465_v5 = vld [vmem:[%s1451_s2] sm:$0xff]  ;;  %v470_v15 = vld [vmem:[%s1451_s2 + $0x28] sm:$0xff]  ;;  %v472_v17 = vld [vmem:[%s1451_s2 + $0x38] sm:$0xff] }
  0x14   :  { %v469_v10 = vld [vmem:[%s1451_s2 + $0x20] sm:$0xff]  ;;  %s961_s2 = smov [#allocation5]  }
  0x15   :  { %s770_s10 = sshll.u32 %s961_s2, 4  ;;  %s771_s10 = int_to_ptr.vmem [resolvable:$true] %s770_s10 }
  0x19   :  { %69 = vadd.xlane.f32.xlu0 %v68_v24 }
  0x1a   :  { %420 = vadd.xlane.f32.xlu1 %v419_v25 }
  0x1b   :  { %66 = vadd.xlane.f32.xlu2 %v65_v26  ;;  %v960_v26 = vmov 0  }
  0x1c   :  { %829 = vset.pattern.permute.xlu0 %v960_v26  ;;  %828 = vset.pattern.permute.xlu1 %v960_v26 }
  0x1d   :  { %830 = vset.pattern.permute.xlu2 %v960_v26 }
  0x21   :  { %417 = vadd.xlane.f32.xlu0 %v416_v33 }
  0x22   :  { %63 = vadd.xlane.f32.xlu1 %v62_v34 }
  0x23   :  { %60 = vadd.xlane.f32.xlu2 %v59_v35 }
  0x29   :  { %57 = vadd.xlane.f32.xlu0 %v56_v42 }
  0x2a   :  { %54 = vadd.xlane.f32.xlu1 %v53_v43 }
  0x2b   :  { %51 = vadd.xlane.f32.xlu2 %v50_v44 }
  0x31   :  { %48 = vadd.xlane.f32.xlu0 %v47_v47 }
  0x7c   :  { %v439_v48 = vpop.xlane.xlu0 %438 }
  0x7d   :  { %452 = vmatpush.msra.mxu2 %v439_v48  ;;  %v433_v49 = vpop.xlane.xlu1 %432 }
  0x7e   :  { %v427_v50 = vpop.xlane.xlu2 %426 }
  0x84   :  { %v436_v51 = vpop.xlane.xlu0 %435 }
  0x85   :  { %453 = vmatpush.msra.mxu2 %v436_v51  ;;  %v430_v52 = vpop.xlane.xlu1 %429 }
  0x86   :  { %v424_v53 = vpop.xlane.xlu2 %423 }
  0x87   :  { %454 = vmatpush.msra.mxu2 %v433_v49 }
  0x89   :  { %455 = vmatpush.msra.mxu2 %v430_v52 }
  0x8b   :  { %456 = vmatpush.msra.mxu2 %v427_v50 }
  0x8c   :  { %v70_v54 = vpop.xlane.xlu0 %69 }
  0x8d   :  { %84 = vmatpush.msra.mxu0 %v70_v54  ;;  %457 = vmatpush.msra.mxu2 %v424_v53  ;;  %v421_v55 = vpop.xlane.xlu1 %420 }
  0x8e   :  { %v67_v56 = vpop.xlane.xlu2 %66 }
  0x8f   :  { %458 = vmatpush.msra.mxu2 %v421_v55  ;;  %85 = vmatpush.msra.mxu0 %v67_v56 }
  0x94   :  { %v418_v58 = vpop.xlane.xlu0 %417 }
  0x95   :  { %459 = vmatpush.msra.mxu2 %v418_v58  ;;  %v64_v59 = vpop.xlane.xlu1 %63 }
  0x96   :  { %v61_v60 = vpop.xlane.xlu2 %60  ;;  %803 = vmatmul.msk.f32.vlgmr.msra.gmra.mxu2 %vm72_vm0, %v440_v57  ;;  %86 = vmatpush.msra.mxu0 %v64_v59 }
  0x98   :  { %87 = vmatpush.msra.mxu0 %v61_v60 }
  0x9c   :  { %v58_v61 = vpop.xlane.xlu0 %57 }
  0x9d   :  { %88 = vmatpush.msra.mxu0 %v58_v61  ;;  %v55_v62 = vpop.xlane.xlu1 %54 }
  0x9e   :  { %v52_v63 = vpop.xlane.xlu2 %51 }
  0x9f   :  { %89 = vmatpush.msra.mxu0 %v55_v62 }
  0xa1   :  { %90 = vmatpush.msra.mxu0 %v52_v63 }
  0xa4   :  { %v49_v1 = vpop.xlane.xlu0 %48 }
  0xa5   :  { %91 = vmatpush.msra.mxu0 %v49_v1 }
  0xa6   :  { %785 = vmatmul.msk.f32.vlgmr.msra.gmra.mxu0 %vm72_vm0, %v71_v0 }
 0x119   :  { %v461_v2 = vpop.f32.mrf.mxu2 }
 0x11a   :  { %v464_v3 = vmax.f32 %v461_v2, 0.0 }
 0x11c   :  { %822 = vmatpush.msk.msra.mxu3 %vm130_vm1, %v464_v3  ;;  %804 = vmatpush.msk.msrb.mxu2 %vm130_vm1, %v464_v3 }
 0x11d   :  { %807 = vmatmul.msk.f32.vlgmr.msra.gmra.mxu3 %vm105_vm2, %v467_v4  ;;  %805 = vmatmul.msk.f32.vlgmr.msrb.gmra.mxu2 %vm105_vm2, %v465_v5 }
 0x123   :  { %v93_v8 = vpop.f32.mrf.mxu0 }
 0x124   :  { %v96_v9 = vmax.f32 %v93_v8, 0.0 }
 0x125   :  { %808 = vmatmul.msk.f32.gmra.mxu3 %vm105_vm2, %v468_v6  ;;  %806 = vmatmul.msk.f32.gmra.mxu2 %vm105_vm2, %v466_v7 }
 0x126   :  { %786 = vmatpush.msk.msrb.mxu0 %vm130_vm1, %v96_v9  ;;  %821 = vmatpush.msk.msra.mxu1 %vm130_vm1, %v96_v9 }
 0x127   :  { %787 = vmatmul.msk.f32.vlgmr.msrb.gmra.mxu0 %vm105_vm2, %v465_v5  ;;  %789 = vmatmul.msk.f32.vlgmr.msra.gmra.mxu1 %vm105_vm2, %v467_v4 }
 0x12d   :  { %809 = vmatmul.msk.f32.gmra.mxu3 %vm105_vm2, %v469_v10 }
 0x12f   :  { %788 = vmatmul.msk.f32.gmra.mxu0 %vm105_vm2, %v466_v7  ;;  %790 = vmatmul.msk.f32.gmra.mxu1 %vm105_vm2, %v468_v6 }
 0x135   :  { %810 = vmatmul.msk.f32.gmra.mxu3 %vm105_vm2, %v470_v15 }
 0x137   :  { %791 = vmatmul.msk.f32.gmra.mxu1 %vm105_vm2, %v469_v10 }
 0x13d   :  { %811 = vmatmul.msk.f32.gmra.mxu3 %vm105_vm2, %v471_v16 }
 0x13f   :  { %792 = vmatmul.msk.f32.gmra.mxu1 %vm105_vm2, %v470_v15 }
 0x145   :  { %812 = vmatmul.msk.f32.gmra.mxu3 %vm105_vm2, %v472_v17 }
 0x147   :  { %793 = vmatmul.msk.f32.gmra.mxu1 %vm105_vm2, %v471_v16 }
 0x14f   :  { %794 = vmatmul.msk.f32.gmra.mxu1 %vm105_vm2, %v472_v17 }
 0x1a0   :  { %v523_v22 = vpop.f32.mrf.mxu3  ;;  %v517_v23 = vpop.f32.mrf.mxu2 }
 0x1a1   :  { %v813_v24 = vmul.f32 -1.442695, %v517_v23  ;;  %v815_v25 = vmul.f32 -1.442695, %v523_v22 }
 0x1a3   :  { %831 = vpow2.f32 %v813_v24 }
 0x1a4   :  { %v151_v33 = vpop.f32.mrf.mxu0  ;;  %v157_v34 = vpop.f32.mrf.mxu1  ;;  %833 = vpow2.f32 %v815_v25 }
 0x1a5   :  { %v795_v35 = vmul.f32 -1.442695, %v151_v33  ;;  %v797_v42 = vmul.f32 -1.442695, %v157_v34 }
 0x1a7   :  { %835 = vpow2.f32 %v795_v35 }
 0x1a8   :  { %837 = vpow2.f32 %v797_v42  ;;  %v526_v43 = vpop.f32.mrf.mxu3  ;;  %v520_v44 = vpop.f32.mrf.mxu2 }
 0x1a9   :  { %v816_v47 = vmul.f32 -1.442695, %v526_v43  ;;  %v832_v48 = vpop.eup %831  ;;  %v814_v49 = vmul.f32 -1.442695, %v520_v44 }
 0x1aa   :  { %v1106_v50 = vadd.f32 1.0, %v832_v48  ;;  %v834_v51 = vpop.eup %833 }
 0x1ab   :  { %839 = vpow2.f32 %v816_v47  ;;  %v1113_v60 = vadd.f32 1.0, %v834_v51 }
 0x1ac   :  { %v154_v52 = vpop.f32.mrf.mxu0  ;;  %v160_v53 = vpop.f32.mrf.mxu1  ;;  %841 = vrcp.f32 %v1106_v50  ;;  %v584_v3 = vand.u32 2147483648, %v1106_v50  ;;  %v582_v10 = vand.u32 2147483647, %v1106_v50  ;;  %vm578_vm5 = vweird.f32 %v1106_v50 }
 0x1ad   :  { %v836_v54 = vpop.eup %835  ;;  %v796_v55 = vmul.f32 -1.442695, %v154_v52  ;;  %v798_v58 = vmul.f32 -1.442695, %v160_v53  ;;  %843 = vpow2.f32 %v814_v49 }
 0x1ae   :  { %v838_v56 = vpop.eup %837  ;;  %v1109_v57 = vadd.f32 1.0, %v836_v54  ;;  %v1145_v26 = vor.u32 1.1754944e-38, %v584_v3  ;;  %vm1183_vm13 = vcmp.eq.f32.partialorder %v582_v10, 8.507059e+37 }
 0x1af   :  { %v1111_v59 = vadd.f32 1.0, %v838_v56  ;;  %845 = vpow2.f32 %v796_v55 }
 0x1b0   :  { %847 = vrcp.f32 %v1109_v57  ;;  %v529_v61 = vpop.f32.mrf.mxu3  ;;  %v218_v0 = vand.u32 2147483648, %v1109_v57  ;;  %v216_v5 = vand.u32 2147483647, %v1109_v57  ;;  %vm212_vm3 = vweird.f32 %v1109_v57 }
 0x1b1   :  { %v840_v62 = vpop.eup %839  ;;  %849 = vrcp.f32 %v1111_v59  ;;  %v817_v63 = vmul.f32 -1.442695, %v529_v61  ;;  %v248_v2 = vand.u32 2147483648, %v1111_v59  ;;  %v246_v8 = vand.u32 2147483647, %v1111_v59 }
 0x1b2   :  { %v1118_v1 = vadd.f32 1.0, %v840_v62  ;;  %851 = vpow2.f32 %v798_v58  ;;  %v1122_v4 = vpop.eup %841  ;;  %v1134_v22 = vor.u32 1.1754944e-38, %v218_v0  ;;  %vm242_vm4 = vweird.f32 %v1111_v59 }
 0x1b3   :  { %853 = vpow2.f32 %v817_v63  ;;  %v844_v6 = vpop.eup %843  ;;  %v574_v9 = vmul.f32 %v1122_v4, %v1106_v50  ;;  %v1141_v25 = vor.u32 1.1754944e-38, %v248_v2  ;;  %vm579_vm6 = vweird.f32 %v1122_v4 }
 0x1b4   :  { %855 = vrcp.f32 %v1113_v60  ;;  %v163_v7 = vpop.f32.mrf.mxu1  ;;  %v1131_v16 = vadd.f32 1.0, %v844_v6  ;;  %vm1150_vm7 = vcmp.eq.f32.partialorder %v216_v5, 8.507059e+37  ;;  %v627_v43 = vand.u32 2147483647, %v1118_v1  ;;  %vm1214_vm2 = vmor %vm578_vm5, %vm579_vm6 }
 0x1b5   :  { %v846_v15 = vpop.eup %845  ;;  %857 = vrcp.f32 %v1118_v1  ;;  %v799_v17 = vmul.f32 -1.442695, %v163_v7  ;;  %v575_v42 = vsub.f32 1.0, %v574_v9  ;;  %vm1157_vm8 = vcmp.eq.f32.partialorder %v246_v8, 8.507059e+37 }
 0x1b6   :  { %v1136_v23 = vpop.eup %847  ;;  %v1138_v24 = vadd.f32 1.0, %v846_v15  ;;  %859 = vrcp.f32 %v1131_v16  ;;  %v597_v51 = vand.u32 2147483647, %v1131_v16  ;;  %v629_v52 = vand.u32 2147483648, %v1118_v1 }
 0x1b7   :  { %v850_v33 = vpop.eup %849  ;;  %v208_v34 = vmul.f32 %v1136_v23, %v1109_v57  ;;  %vm213_vm9 = vweird.f32 %v1136_v23  ;;  %vm593_vm10 = vweird.f32 %v1131_v16  ;;  %v576_v2 = vmul.f32 %v1122_v4, %v575_v42 }
 0x1b8   :  { %v852_v44 = vpop.eup %851  ;;  %861 = vrcp.f32 %v1138_v24  ;;  %v532_v47 = vpop.f32.mrf.mxu3  ;;  %v238_v48 = vmul.f32 %v850_v33, %v1111_v59  ;;  %vm243_vm11 = vweird.f32 %v850_v33  ;;  %vm1177_vm12 = vcmp.eq.f32.partialorder %v597_v51, 8.507059e+37  ;;  %vm214_vm15 = vmor %vm212_vm3, %vm213_vm9 }
 0x1b9   :  { %v854_v53 = vpop.eup %853  ;;  %v1163_v54 = vadd.f32 1.0, %v852_v44  ;;  %863 = vpow2.f32 %v799_v17  ;;  %v818_v55 = vmul.f32 -1.442695, %v532_v47  ;;  %v209_v56 = vsub.f32 1.0, %v208_v34  ;;  %vm244_vm0 = vmor %vm242_vm4, %vm243_vm11 }
 0x1ba   :  { %v1165_v58 = vpop.eup %855  ;;  %v1167_v61 = vadd.f32 1.0, %v854_v53  ;;  %v239_v62 = vsub.f32 1.0, %v238_v48  ;;  %v599_v7 = vand.u32 2147483648, %v1131_v16  ;;  %vm227_vm14 = vweird.f32 %v1138_v24 }
 0x1bb   :  { %v1171_v63 = vpop.eup %857  ;;  %865 = vrcp.f32 %v1163_v54  ;;  %v210_v0 = vmul.f32 %v1136_v23, %v209_v56  ;;  %v577_v47 = vadd.f32 %v1122_v4, %v576_v2  ;;  %v231_v48 = vand.u32 2147483647, %v1138_v24 }
 0x1bc   :  { %867 = vrcp.f32 %v1167_v61  ;;  %v166_v3 = vpop.f32.mrf.mxu1  ;;  %v240_v5 = vmul.f32 %v850_v33, %v239_v62  ;;  %v860_v8 = vpop.eup %859 }
 0x1bd   :  { %869 = vpow2.f32 %v818_v55  ;;  %v800_v9 = vmul.f32 -1.442695, %v166_v3  ;;  %v211_v15 = vadd.f32 %v1136_v23, %v210_v0  ;;  %v589_v44 = vmul.f32 %v860_v8, %v1131_v16 }
 0x1be   :  { %v862_v34 = vpop.eup %861  ;;  %v241_v42 = vadd.f32 %v850_v33, %v240_v5  ;;  %vm594_vm1 = vweird.f32 %v860_v8  ;;  %vm1229_vm5 = vcmp.eq.f32.partialorder %v231_v48, 8.507059e+37  ;;  %v581_v16 = vsel %vm1214_vm2, %v1122_v4, %v577_v47 }
 0x1bf   :  { %v864_v51 = vpop.eup %863  ;;  %871 = vpow2.f32 %v800_v9  ;;  %v215_v10 = vsel %vm214_vm15, %v1136_v23, %v211_v15  ;;  %v223_v53 = vmul.f32 %v862_v34, %v1138_v24  ;;  %v590_v0 = vsub.f32 1.0, %v589_v44  ;;  %vm1225_vm4 = vmor %vm593_vm10, %vm594_vm1 }
 0x1c0   :  { %v1200_v55 = vadd.f32 1.0, %v864_v51  ;;  %v535_v57 = vpop.f32.mrf.mxu3  ;;  %v245_v56 = vsel %vm244_vm0, %v850_v33, %v241_v42  ;;  %v220_v62 = vsel %vm1150_vm7, %v1134_v22, %v215_v10  ;;  %v600_v23 = vor.u32 1.1754944e-38, %v599_v7 }
 0x1c1   :  { %v1205_v2 = vpop.eup %865  ;;  %v819_v3 = vmul.f32 -1.442695, %v535_v57  ;;  %v250_v59 = vsel %vm1157_vm8, %v1141_v25, %v245_v56  ;;  %329 = vperm.xlu1 %828, %v220_v62   ;;  %v224_v35 = vsub.f32 1.0, %v223_v53  ;;  %v591_v5 = vmul.f32 %v860_v8, %v590_v0 }
 0x1c2   :  { %v1218_v22 = vpop.eup %867  ;;  %873 = vrcp.f32 %v1200_v55  ;;  %339 = vperm.xlu0 %829, %v250_v59   ;;  %vm228_vm3 = vweird.f32 %v862_v34  ;;  %v233_v25 = vand.u32 2147483648, %v1138_v24  ;;  %v642_v4 = vand.u32 2147483647, %v1167_v61 }
 0x1c3   :  { %v870_v49 = vpop.eup %869  ;;  %875 = vpow2.f32 %v819_v3  ;;  %v225_v7 = vmul.f32 %v862_v34, %v224_v35  ;;  %v634_v15 = vmul.f32 %v1218_v22, %v1167_v61  ;;  %v592_v51 = vadd.f32 %v860_v8, %v591_v5  ;;  %vm1242_vm6 = vmor %vm227_vm14, %vm228_vm3 }
 0x1c4   :  { %v1235_v42 = vadd.f32 1.0, %v870_v49  ;;  %v169_v44 = vpop.f32.mrf.mxu1  ;;  %v234_v48 = vor.u32 1.1754944e-38, %v233_v25  ;;  %vm639_vm7 = vweird.f32 %v1218_v22  ;;  %v644_v24 = vand.u32 2147483648, %v1167_v61 }
 0x1c5   :  { %v872_v53 = vpop.eup %871  ;;  %v801_v57 = vmul.f32 -1.442695, %v169_v44  ;;  %v226_v56 = vadd.f32 %v862_v34, %v225_v7  ;;  %v635_v62 = vsub.f32 1.0, %v634_v15  ;;  %v596_v3 = vsel %vm1225_vm4, %v860_v8, %v592_v51 }
 0x1c6   :  { %v1247_v0 = vadd.f32 1.0, %v872_v53  ;;  %v601_v47 = vsel %vm1177_vm12, %v600_v23, %v596_v3  ;;  %v586_v8 = vsel %vm1183_vm13, %v1145_v26, %v581_v16  ;;  %vm638_vm8 = vweird.f32 %v1167_v61 }
 0x1c7   :  { %877 = vpow2.f32 %v801_v57  ;;  %v230_v59 = vsel %vm1242_vm6, %v862_v34, %v226_v56  ;;  %v636_v33 = vmul.f32 %v1218_v22, %v635_v62  ;;  %vm1272_vm9 = vmor %vm638_vm8, %vm639_vm7  ;;  %vm643_vm10 = vcmp.eq.f32.partialorder %v642_v4, 8.507059e+37 }
 0x1c8   :  { %v874_v35 = vpop.eup %873  ;;  %879 = vrcp.f32 %v1235_v42  ;;  %v538_v5 = vpop.f32.mrf.mxu3  ;;  %v235_v25 = vsel %vm1229_vm5, %v234_v48, %v230_v59  ;;  %v645_v61 = vor.u32 1.1754944e-38, %v644_v24  ;;  %vm272_vm11 = vweird.f32 %v1200_v55 }
 0x1c9   :  { %v876_v6 = vpop.eup %875  ;;  %881 = vrcp.f32 %v1247_v0  ;;  %v820_v23 = vmul.f32 -1.442695, %v538_v5  ;;  %695 = vperm.xlu1 %828, %v586_v8   ;;  %334 = vperm.xlu2 %830, %v235_v25   ;;  %v637_v34 = vadd.f32 %v1218_v22, %v636_v33  ;;  %v268_v49 = vmul.f32 %v874_v35, %v1200_v55 }
 0x1ca   :  { %v1268_v50 = vadd.f32 1.0, %v876_v6  ;;  %700 = vperm.xlu0 %829, %v601_v47   ;;  %v253_v9 = vmul.f32 %v1205_v2, %v1163_v54  ;;  %vm273_vm12 = vweird.f32 %v874_v35  ;;  %v276_v44 = vand.u32 2147483647, %v1200_v55 }
 0x1cb   :  { %883 = vpow2.f32 %v820_v23  ;;  %v641_v17 = vsel %vm1272_vm9, %v1218_v22, %v637_v34  ;;  %v269_v7 = vsub.f32 1.0, %v268_v49  ;;  %v278_v51 = vand.u32 2147483648, %v1200_v55  ;;  %vm274_vm15 = vmor %vm272_vm11, %vm273_vm12 }
 0x1cc   :  { %885 = vrcp.f32 %v1268_v50  ;;  %v172_v15 = vpop.f32.mrf.mxu1  ;;  %v646_v48 = vsel %vm643_vm10, %v645_v61, %v641_v17  ;;  %v254_v57 = vsub.f32 1.0, %v253_v9  ;;  %vm623_vm13 = vweird.f32 %v1118_v1 }
 0x1cd   :  { %v878_v16 = vpop.eup %877  ;;  %v802_v10 = vmul.f32 -1.442695, %v172_v15  ;;  %v270_v53 = vmul.f32 %v874_v35, %v269_v7  ;;  %vm258_vm14 = vweird.f32 %v1205_v2  ;;  %v261_v62 = vand.u32 2147483647, %v1163_v54 }
 0x1ce   :  { %v1286_v22 = vpop.eup %879  ;;  %v1288_v56 = vadd.f32 1.0, %v878_v16  ;;  %v263_v3 = vand.u32 2147483648, %v1163_v54  ;;  %v255_v47 = vmul.f32 %v1205_v2, %v254_v57  ;;  %v619_v59 = vmul.f32 %v1171_v63, %v1118_v1 }
 0x1cf   :  { %v1293_v4 = vpop.eup %881  ;;  %887 = vpow2.f32 %v802_v10  ;;  %v271_v24 = vadd.f32 %v874_v35, %v270_v53  ;;  %vm277_vm0 = vcmp.eq.f32.partialorder %v276_v44, 8.507059e+37  ;;  %v279_v33 = vor.u32 1.1754944e-38, %v278_v51 }
 0x1d0   :  { %889 = vrcp.f32 %v1288_v56  ;;  %vm257_vm1 = vweird.f32 %v1163_v54  ;;  %vm608_vm2 = vweird.f32 %v1113_v60  ;;  %v256_v25 = vadd.f32 %v1205_v2, %v255_v47 }
 0x1d1   :  { %v884_v5 = vpop.eup %883  ;;  %v275_v8 = vsel %vm274_vm15, %v874_v35, %v271_v24  ;;  %vm262_vm3 = vcmp.eq.f32.partialorder %v261_v62, 8.507059e+37  ;;  %v620_v6 = vsub.f32 1.0, %v619_v59  ;;  %vm259_vm4 = vmor %vm257_vm1, %vm258_vm14  ;;  %v264_v55 = vor.u32 1.1754944e-38, %v263_v3 }
 0x1d2   :  { %v1305_v23 = vpop.eup %885  ;;  %v1307_v34 = vadd.f32 1.0, %v884_v5  ;;  %715 = vperm.xlu0 %829, %v646_v48   ;;  %v280_v49 = vsel %vm277_vm0, %v279_v33, %v275_v8  ;;  %v604_v54 = vmul.f32 %v1165_v58, %v1113_v60  ;;  %v260_v35 = vsel %vm259_vm4, %v1205_v2, %v256_v25 }
 0x1d3   :  { %349 = vperm.xlu1 %828, %v280_v49   ;;  %v621_v26 = vmul.f32 %v1171_v63, %v620_v6  ;;  %vm624_vm5 = vweird.f32 %v1171_v63  ;;  %v612_v61 = vand.u32 2147483647, %v1113_v60  ;;  %v265_v17 = vsel %vm262_vm3, %v264_v55, %v260_v35 }
 0x1d4   :  { %891 = vrcp.f32 %v1307_v34  ;;  %v605_v7 = vsub.f32 1.0, %v604_v54  ;;  %v614_v9 = vand.u32 2147483648, %v1113_v60  ;;  %344 = vperm.xlu2 %830, %v265_v17   ;;  %vm1322_vm6 = vcmp.eq.f32.partialorder %v627_v43, 8.507059e+37  ;;  %vm625_vm7 = vmor %vm623_vm13, %vm624_vm5 }
 0x1d5   :  { %v888_v15 = vpop.eup %887  ;;  %v622_v44 = vadd.f32 %v1171_v63, %v621_v26  ;;  %v630_v51 = vor.u32 1.1754944e-38, %v629_v52  ;;  %v306_v16 = vand.u32 2147483647, %v1288_v56  ;;  %vm609_vm8 = vweird.f32 %v1165_v58 }
 0x1d6   :  { %v890_v10 = vpop.eup %889  ;;  %v1329_v48 = vadd.f32 1.0, %v888_v15  ;;  %v606_v53 = vmul.f32 %v1165_v58, %v605_v7  ;;  %v308_v43 = vand.u32 2147483648, %v1288_v56  ;;  %vm1337_vm9 = vcmp.eq.f32.partialorder %v612_v61, 8.507059e+37  ;;  %vm610_vm12 = vmor %vm608_vm2, %vm609_vm8 }
 0x1d7   :  { %v626_v57 = vsel %vm625_vm7, %v1171_v63, %v622_v44  ;;  %v298_v52 = vmul.f32 %v890_v10, %v1288_v56  ;;  %vm302_vm10 = vweird.f32 %v1288_v56  ;;  %v615_v3 = vor.u32 1.1754944e-38, %v614_v9 }
 0x1d8   :  { %893 = vrcp.f32 %v1329_v48  ;;  %v607_v1 = vadd.f32 %v1165_v58, %v606_v53  ;;  %vm303_vm11 = vweird.f32 %v890_v10  ;;  %v631_v24 = vsel %vm1322_vm6, %v630_v51, %v626_v57 }
 0x1d9   :  { %v299_v63 = vsub.f32 1.0, %v298_v52  ;;  %vm1349_vm13 = vcmp.eq.f32.partialorder %v306_v16, 8.507059e+37  ;;  %v283_v59 = vmul.f32 %v1293_v4, %v1247_v0  ;;  %v309_v8 = vor.u32 1.1754944e-38, %v308_v43  ;;  %vm304_vm1 = vmor %vm302_vm10, %vm303_vm11 }
 0x1da   :  { %v892_v33 = vpop.eup %891  ;;  %v611_v5 = vsel %vm610_vm12, %v1165_v58, %v607_v1  ;;  %v291_v25 = vand.u32 2147483647, %v1247_v0  ;;  %v293_v6 = vand.u32 2147483648, %v1247_v0  ;;  %vm287_vm14 = vweird.f32 %v1247_v0 }
 0x1db   :  { %710 = vperm.xlu1 %828, %v631_v24   ;;  %v300_v49 = vmul.f32 %v890_v10, %v299_v63  ;;  %v284_v60 = vsub.f32 1.0, %v283_v59  ;;  %v679_v55 = vmul.f32 %v892_v33, %v1307_v34  ;;  %v616_v54 = vsel %vm1337_vm9, %v615_v3, %v611_v5 }
 0x1dc   :  { %vm288_vm15 = vweird.f32 %v1293_v4  ;;  %vm683_vm0 = vweird.f32 %v1307_v34  ;;  %v687_v58 = vand.u32 2147483647, %v1307_v34  ;;  %705 = vperm.xlu2 %830, %v616_v54   ;;  %v689_v17 = vand.u32 2147483648, %v1307_v34 }
 0x1dd   :  { %v301_v35 = vadd.f32 %v890_v10, %v300_v49  ;;  %v285_v26 = vmul.f32 %v1293_v4, %v284_v60  ;;  %v680_v61 = vsub.f32 1.0, %v679_v55  ;;  %vm1370_vm2 = vcmp.eq.f32.partialorder %v291_v25, 8.507059e+37  ;;  %vm289_vm5 = vmor %vm287_vm14, %vm288_vm15 }
 0x1de   :  { %v894_v7 = vpop.eup %893  ;;  %v294_v15 = vor.u32 1.1754944e-38, %v293_v6  ;;  %vm684_vm3 = vweird.f32 %v892_v33  ;;  %v664_v44 = vmul.f32 %v1305_v23, %v1268_v50  ;;  %vm1377_vm4 = vcmp.eq.f32.partialorder %v687_v58, 8.507059e+37 }
 0x1df   :  { %v305_v2 = vsel %vm304_vm1, %v890_v10, %v301_v35  ;;  %v286_v51 = vadd.f32 %v1293_v4, %v285_v26  ;;  %v681_v16 = vmul.f32 %v892_v33, %v680_v61  ;;  %vm668_vm6 = vweird.f32 %v1268_v50  ;;  %vm685_vm8 = vmor %vm683_vm0, %vm684_vm3 }
 0x1e0   :  { %v310_v56 = vsel %vm1349_vm13, %v309_v8, %v305_v2  ;;  %v665_v43 = vsub.f32 1.0, %v664_v44  ;;  %vm669_vm7 = vweird.f32 %v1305_v23  ;;  %v690_v62 = vor.u32 1.1754944e-38, %v689_v17 }
 0x1e1   :  { %v290_v10 = vsel %vm289_vm5, %v1293_v4, %v286_v51  ;;  %v682_v57 = vadd.f32 %v892_v33, %v681_v16  ;;  %v313_v52 = vmul.f32 %v894_v7, %v1329_v48  ;;  %v674_v3 = vand.u32 2147483648, %v1268_v50  ;;  %vm670_vm11 = vmor %vm668_vm6, %vm669_vm7 }
 0x1e2   :  { %v295_v1 = vsel %vm1370_vm2, %v294_v15, %v290_v10  ;;  %v666_v0 = vmul.f32 %v1305_v23, %v665_v43  ;;  %vm317_vm9 = vweird.f32 %v1329_v48  ;;  %vm318_vm10 = vweird.f32 %v894_v7 }
 0x1e3   :  { %359 = vperm.xlu1 %828, %v310_v56   ;;  %v686_v24 = vsel %vm685_vm8, %v892_v33, %v682_v57  ;;  %v314_v4 = vsub.f32 1.0, %v313_v52  ;;  %v321_v63 = vand.u32 2147483647, %v1329_v48  ;;  %v323_v34 = vand.u32 2147483648, %v1329_v48  ;;  %vm319_vm12 = vmor %vm317_vm9, %vm318_vm10 }
 0x1e4   :  { %v691_v47 = vsel %vm1377_vm4, %v690_v62, %v686_v24  ;;  %v667_v59 = vadd.f32 %v1305_v23, %v666_v0  ;;  %v649_v5 = vmul.f32 %v1286_v22, %v1235_v42  ;;  %354 = vperm.xlu2 %830, %v295_v1   ;;  %v672_v33 = vand.u32 2147483647, %v1268_v50 }
 0x1e5   :  { %730 = vperm.xlu0 %829, %v691_v47   ;;  %v315_v8 = vmul.f32 %v894_v7, %v314_v4  ;;  %v324_v25 = vor.u32 1.1754944e-38, %v323_v34  ;;  %vm322_vm13 = vcmp.eq.f32.partialorder %v321_v63, 8.507059e+37  ;;  %v675_v55 = vor.u32 1.1754944e-38, %v674_v3  ;;  %v898_v47 = vld [vmem:[#allocation2 + $0xd8] sm:$0xff] }
 0x1e6   :  { %v650_v6 = vsub.f32 1.0, %v649_v5  ;;  %v671_v49 = vsel %vm670_vm11, %v1305_v23, %v667_v59  ;;  %vm673_vm14 = vcmp.eq.f32.partialorder %v672_v33, 8.507059e+37  ;;  %vm654_vm15 = vweird.f32 %v1286_v22  ;;  %v900_v5 = vld [vmem:[#allocation2 + $0x68] sm:$0xff] }
 0x1e7   :  { %v316_v60 = vadd.f32 %v894_v7, %v315_v8  ;;  %v676_v35 = vsel %vm673_vm14, %v675_v55, %v671_v49  ;;  %v659_v48 = vand.u32 2147483648, %v1235_v42  ;;  %vm653_vm0 = vweird.f32 %v1235_v42  ;;  %v902_v49 = vld [vmem:[#allocation2 + $0xf8] sm:$0xff] }
 0x1e8   :  { %v651_v58 = vmul.f32 %v1286_v22, %v650_v6  ;;  %v657_v23 = vand.u32 2147483647, %v1235_v42  ;;  %vm655_vm1 = vmor %vm653_vm0, %vm654_vm15 }
 0x1e9   :  { %v320_v54 = vsel %vm319_vm12, %v894_v7, %v316_v60  ;;  %v660_v17 = vor.u32 1.1754944e-38, %v659_v48 }
 0x1ea   :  { %v325_v26 = vsel %vm322_vm13, %v324_v25, %v320_v54  ;;  %v652_v50 = vadd.f32 %v1286_v22, %v651_v58  ;;  %vm658_vm2 = vcmp.eq.f32.partialorder %v657_v23, 8.507059e+37  ;;  %v901_v25 = vld [vmem:[#allocation2 + $0xf0] sm:$0xff]  ;;  %v903_v54 = vld [vmem:[#allocation2 + $0xe0] sm:$0xff] }
 0x1eb   :  { %725 = vperm.xlu1 %828, %v676_v35   ;;  %v904_v35 = vld [vmem:[#allocation2 + $0xe8] sm:$0xff] }
 0x1ec   :  { %364 = vperm.xlu2 %830, %v325_v26   ;;  %v656_v61 = vsel %vm655_vm1, %v1286_v22, %v652_v50 }
 0x1ed   :  { %v661_v7 = vsel %vm658_vm2, %v660_v17, %v656_v61 }
 0x1f4   :  { %720 = vperm.xlu2 %830, %v661_v7  }
 0x223   :  { %v335_v9 = vpop.permute.xlu2 %334 }
 0x224   :  { %v369_v15 = vmul.f32 %v335_v9, %v1038_v40  ;;  %v370_v44 = vmul.f32 %v335_v9, %v1040_v41 }
 0x226   :  { %385 = vst [vmem:[#allocation5 + $0x10] sm:$0xff] %v369_v15 }
 0x227   :  { %386 = vst [vmem:[#allocation5 + $0x18] sm:$0xff] %v370_v44 }
 0x22e   :  { %v345_v2 = vpop.permute.xlu2 %344 }
 0x22f   :  { %v373_v51 = vmul.f32 %v345_v2, %v1030_v36  ;;  %v374_v16 = vmul.f32 %v345_v2, %v1032_v37 }
 0x231   :  { %389 = vst [vmem:[#allocation5 + $0x30] sm:$0xff] %v373_v51 }
 0x232   :  { %390 = vst [vmem:[#allocation5 + $0x38] sm:$0xff] %v374_v16 }
 0x233   :  { %v330_v42 = vpop.permute.xlu1 %329 }
 0x234   :  { %v340_v22 = vpop.permute.xlu0 %339  ;;  %v367_v53 = vmul.f32 %v330_v42, %v1048_v45  ;;  %v368_v40 = vmul.f32 %v330_v42, %v1050_v46 }
 0x235   :  { %v371_v56 = vmul.f32 %v340_v22, %v1034_v38  ;;  %v372_v43 = vmul.f32 %v340_v22, %v1036_v39 }
 0x236   :  { %383 = vst [vmem:[#allocation5] sm:$0xff] %v367_v53  ;;  %v706_v41 = vpop.permute.xlu2 %705 }
 0x237   :  { %387 = vst [vmem:[#allocation5 + $0x20] sm:$0xff] %v371_v56  ;;  %v737_v36 = vmul.f32 %v706_v41, %v992_v13  ;;  %v738_v37 = vmul.f32 %v706_v41, %v994_v14 }
 0x238   :  { %388 = vst [vmem:[#allocation5 + $0x28] sm:$0xff] %v372_v43 }
 0x239   :  { %384 = vst [vmem:[#allocation5 + $0x8] sm:$0xff] %v368_v40 }
 0x23a   :  { %754 = vst [vmem:[#allocation5 + $0xa0] sm:$0xff] %v737_v36 }
 0x23b   :  { %755 = vst [vmem:[#allocation5 + $0xa8] sm:$0xff] %v738_v37  ;;  %v696_v10 = vpop.permute.xlu1 %695 }
 0x23c   :  { %v701_v57 = vpop.permute.xlu0 %700  ;;  %v733_v45 = vmul.f32 %v696_v10, %v1012_v27  ;;  %v734_v46 = vmul.f32 %v696_v10, %v1014_v28 }
 0x23d   :  { %v735_v38 = vmul.f32 %v701_v57, %v1004_v20  ;;  %v736_v39 = vmul.f32 %v701_v57, %v1006_v21 }
 0x23e   :  { %750 = vst [vmem:[#allocation5 + $0x80] sm:$0xff] %v733_v45  ;;  %v355_v62 = vpop.permute.xlu2 %354 }
 0x23f   :  { %752 = vst [vmem:[#allocation5 + $0x90] sm:$0xff] %v735_v38  ;;  %v377_v13 = vmul.f32 %v355_v62, %v1016_v29  ;;  %v378_v14 = vmul.f32 %v355_v62, %v1018_v30 }
 0x240   :  { %753 = vst [vmem:[#allocation5 + $0x98] sm:$0xff] %v736_v39 }
 0x241   :  { %751 = vst [vmem:[#allocation5 + $0x88] sm:$0xff] %v734_v46 }
 0x242   :  { %393 = vst [vmem:[#allocation5 + $0x50] sm:$0xff] %v377_v13 }
 0x243   :  { %394 = vst [vmem:[#allocation5 + $0x58] sm:$0xff] %v378_v14 }
 0x244   :  { %v716_v52 = vpop.permute.xlu0 %715 }
 0x245   :  { %v741_v27 = vmul.f32 %v716_v52, %v988_v11  ;;  %v742_v20 = vmul.f32 %v716_v52, %v990_v12  ;;  %v350_v1 = vpop.permute.xlu1 %349  ;;  %v895_v11 = vld [vmem:[#allocation2 + $0xb0] sm:$0xff]  ;;  %v896_v12 = vld [vmem:[#allocation2 + $0xb8] sm:$0xff] }
 0x246   :  { %v375_v21 = vmul.f32 %v350_v1, %v1020_v31  ;;  %v376_v28 = vmul.f32 %v350_v1, %v1022_v32  ;;  %v365_v0 = vpop.permute.xlu2 %364  ;;  %v897_v31 = vld [vmem:[#allocation2 + $0xd0] sm:$0xff] }
 0x247   :  { %758 = vst [vmem:[#allocation5 + $0xc0] sm:$0xff] %v741_v27  ;;  %v381_v29 = vmul.f32 %v365_v0, %v1000_v18  ;;  %v382_v30 = vmul.f32 %v365_v0, %v1002_v19  ;;  %v899_v19 = vld [vmem:[#allocation2 + $0x60] sm:$0xff] }
 0x248   :  { %759 = vst [vmem:[#allocation5 + $0xc8] sm:$0xff] %v742_v20 }
 0x249   :  { %391 = vst [vmem:[#allocation5 + $0x40] sm:$0xff] %v375_v21 }
 0x24a   :  { %392 = vst [vmem:[#allocation5 + $0x48] sm:$0xff] %v376_v28 }
 0x24b   :  { %397 = vst [vmem:[#allocation5 + $0x70] sm:$0xff] %v381_v29 }
 0x24c   :  { %398 = vst [vmem:[#allocation5 + $0x78] sm:$0xff] %v382_v30 }
 0x24d   :  { %v711_v3 = vpop.permute.xlu1 %710 }
 0x24e   :  { %v739_v24 = vmul.f32 %v895_v11, %v711_v3  ;;  %v740_v4 = vmul.f32 %v896_v12, %v711_v3  ;;  %v721_v63 = vpop.permute.xlu2 %720 }
 0x24f   :  { %v743_v32 = vmul.f32 %v897_v31, %v721_v63  ;;  %v744_v59 = vmul.f32 %v898_v47, %v721_v63 }
 0x250   :  { %756 = vst [vmem:[#allocation5 + $0xb0] sm:$0xff] %v739_v24 }
 0x251   :  { %757 = vst [vmem:[#allocation5 + $0xb8] sm:$0xff] %v740_v4 }
 0x252   :  { %760 = vst [vmem:[#allocation5 + $0xd0] sm:$0xff] %v743_v32 }
 0x253   :  { %761 = vst [vmem:[#allocation5 + $0xd8] sm:$0xff] %v744_v59 }
 0x255   :  { %v360_v18 = vpop.permute.xlu1 %359 }
 0x256   :  { %v379_v34 = vmul.f32 %v899_v19, %v360_v18  ;;  %v380_v33 = vmul.f32 %v900_v5, %v360_v18 }
 0x257   :  { %v731_v8 = vpop.permute.xlu0 %730 }
 0x258   :  { %395 = vst [vmem:[#allocation5 + $0x60] sm:$0xff] %v379_v34  ;;  %v747_v6 = vmul.f32 %v901_v25, %v731_v8  ;;  %v748_v60 = vmul.f32 %v902_v49, %v731_v8 }
 0x259   :  { %396 = vst [vmem:[#allocation5 + $0x68] sm:$0xff] %v380_v33 }
 0x25a   :  { %764 = vst [vmem:[#allocation5 + $0xf0] sm:$0xff] %v747_v6 }
 0x25b   :  { %765 = vst [vmem:[#allocation5 + $0xf8] sm:$0xff] %v748_v60 }
 0x25d   :  { %v726_v55 = vpop.permute.xlu1 %725 }
 0x25e   :  { %v745_v58 = vmul.f32 %v903_v54, %v726_v55  ;;  %v746_v26 = vmul.f32 %v904_v35, %v726_v55 }
 0x260   :  { %762 = vst [vmem:[#allocation5 + $0xe0] sm:$0xff] %v745_v58 }
 0x261   :  { %763 = vst [vmem:[#allocation5 + $0xe8] sm:$0xff] %v746_v26 }
 0x262   :  { %778 = dma.vmem_to_hbm [thread:$0]  %s771_s10, 4096, %s773_s13, [#allocation4], %s958_s17, %s958_s17, %s959_s18  }
 0x263   :  { %955 = dma.done.wait [#allocation4], 4096  }
 0x264   :  { %956 = vsyncadd [#allocation4], 4294963200 }
 0x265   :  { %783 = vsyncpa [#allocation3], 1 }
 0x266   :  { %784 = vsyncpa [#allocation4], 1 }

</bundles_post_ra>
